<compile_context>
chip_gen: v7x
topology: tpu7x:2x2x1
jax: 0.10.0
libtpu: 0.0.40
codegen_flags: <defaults>
</compile_context>

<pallas_src>
import jax
import jax.numpy as jnp
from jax.experimental import pallas as pl
from jax.experimental.pallas import tpu as pltpu


def _make_kernel(S, TS, Tc, ragged, B):
    def kernel(x_ref, y_ref, m_ref, hub_ref, msk_ref):
        n = pl.program_id(1)

        @pl.when(n == 0)
        def _init():
            hub_ref[...] = jnp.zeros_like(hub_ref)
            msk_ref[...] = jnp.zeros_like(msk_ref)

        x = x_ref[...].astype(jnp.float32)
        y = y_ref[...].astype(jnp.float32)
        m = m_ref[...].astype(jnp.float32)

        d = (x - y) * m                      # one fewer VPU multiply than x*m - y*m

        if ragged:
            # Mask rows past the true spatial extent S (Pallas leaves OOB block
            # rows undefined; garbage could be NaN/Inf, so mask d itself and m).
            c = pl.program_id(0)
            row0 = (c * Tc + n) * TS
            rows = jax.lax.broadcasted_iota(jnp.int32, (B, TS, 128), 1) + row0
            valid = rows < S
            d = jnp.where(valid, d, 0.0)
            m = jnp.where(valid, m, 0.0)

        ad = jnp.abs(d)
        t = jnp.minimum(ad, 1.0)             # branchless SmoothL1 (beta = 1)
        hub = t * (ad - 0.5 * t)

        # Lane-wide (B, 128) accumulators resident across the reduction axis.
        hub_ref[...] += jnp.sum(hub, axis=1)
        msk_ref[...] += jnp.sum(m, axis=1)

    return kernel


def masked_huber_loss(output, labels, mask, *, target_tile_bytes=4 << 20):
    B = output.shape[0]
    N = 1
    for s in output.shape[1:]:
        N *= s

    x = output.reshape(B, N)
    y = labels.reshape(B, N)
    m = mask.reshape(B, N)

    # Lane-dense view: (B, S, 128). Only a tiny (<128 elems/row) zero pad when N
    # is not a multiple of 128; zeros contribute 0 to both sums.
    # TODO(synk): a fully pad-free path for N % 128 != 0 would need a partial-lane
    # tail mask; the <=127-element pad is kept for simplicity.
    N128 = -(-N // 128) * 128
    if N128 != N:
        pad = [(0, 0), (0, N128 - N)]
        x = jnp.pad(x, pad)
        y = jnp.pad(y, pad)
        m = jnp.pad(m, pad)
    S = N128 // 128
    x = x.reshape(B, S, 128)
    y = y.reshape(B, S, 128)
    m = m.reshape(B, S, 128)

    itemsizes = [jnp.dtype(a.dtype).itemsize for a in (x, y, m)]
    max_item = max(itemsizes)
    # Sublane multiple for the narrowest streamed dtype (f32:8, bf16:16, int8/bool:32).
    sub = {4: 8, 2: 16, 1: 32}.get(min(itemsizes), 8)

    ts = target_tile_bytes // (B * 128 * max_item)
    ts = max(sub, (ts // sub) * sub)
    TS = S if ts >= S else ts                 # full extent is always a legal block
    T = -(-S // TS)                           # number of reduction tiles

    # Split the reduction into NC chunks so v7x's second TensorCore gets work
    # (harmless sequential extra chunk on 1-TC chips).
    NC = 2 if T >= 2 else 1
    Tc = -(-T // NC)
    ragged = (NC * Tc * TS) != S

    in_spec = pl.BlockSpec(
        (B, TS, 128), lambda c, n: (0, jnp.minimum(c * Tc + n, T - 1), 0)
    )
    out_spec = pl.BlockSpec((None, B, 128), lambda c, n: (c, 0, 0))

    # VMEM: 3 inputs x 2 pipeline buffers of the chosen tile, plus headroom.
    need = 2 * B * TS * 128 * sum(itemsizes)
    vmem_limit = int(min(48 << 20, max(16 << 20, need + (8 << 20))))

    hub_p, msk_p = pl.pallas_call(
        _make_kernel(S, TS, Tc, ragged, B),
        out_shape=(
            jax.ShapeDtypeStruct((NC, B, 128), jnp.float32),
            jax.ShapeDtypeStruct((NC, B, 128), jnp.float32),
        ),
        grid=(NC, Tc),
        in_specs=[in_spec, in_spec, in_spec],
        out_specs=(out_spec, out_spec),
        compiler_params=pltpu.CompilerParams(
            dimension_semantics=("parallel", "arbitrary"),
            vmem_limit_bytes=vmem_limit,
        ),
    )(x, y, m)

    # Tiny epilogue in the wrapper: cross-lane/chunk reduce, per-batch divide, mean.
    hub_b = jnp.sum(hub_p, axis=(0, 2))       # (B,)
    msk_b = jnp.sum(msk_p, axis=(0, 2))       # (B,)
    return jnp.mean(hub_b / msk_b)


def _reference(output, labels, mask):
    x = output.astype(jnp.float32)
    y = labels.astype(jnp.float32)
    m = mask.astype(jnp.float32)
    d = x * m - y * m
    ad = jnp.abs(d)
    hub = jnp.where(ad < 1.0, 0.5 * d * d, ad - 0.5)
    l = jnp.sum(hub, axis=(1, 2)) / jnp.sum(m, axis=(1, 2))
    return jnp.mean(l)


if __name__ == "__main__":
    key = jax.random.PRNGKey(0)
    ks = jax.random.split(key, 9)

    # Case 1: canonical small shape, f32, N multiple of 128, single tile.
    B, H, W = 2, 16, 16
    out1 = jax.random.normal(ks[0], (B, H, W), jnp.float32) * 2.0
    lab1 = jax.random.normal(ks[1], (B, H, W), jnp.float32) * 2.0
    msk1 = (jax.random.uniform(ks[2], (B, H, W)) > 0.3).astype(jnp.float32)
    loss1 = jax.block_until_ready(masked_huber_loss(out1, lab1, msk1))
    ref1 = _reference(out1, lab1, msk1)
    assert jnp.allclose(loss1, ref1, rtol=1e-5, atol=1e-5), (loss1, ref1)

    # Case 2: bf16 activations + f32 mask, tiny tiles to exercise the dual-chunk
    # ("parallel") axis and the in-kernel ragged-tail masking.
    B2, H2, W2 = 2, 48, 64
    out2 = (jax.random.normal(ks[3], (B2, H2, W2), jnp.float32) * 2.0).astype(jnp.bfloat16)
    lab2 = (jax.random.normal(ks[4], (B2, H2, W2), jnp.float32) * 2.0).astype(jnp.bfloat16)
    msk2 = (jax.random.uniform(ks[5], (B2, H2, W2)) > 0.3).astype(jnp.float32)
    loss2 = jax.block_until_ready(masked_huber_loss(out2, lab2, msk2, target_tile_bytes=4096))
    ref2 = _reference(out2, lab2, msk2)
    assert jnp.allclose(loss2, ref2, rtol=1e-5, atol=1e-5), (loss2, ref2)

    # Case 3: N not a multiple of 128 (exercises the small pad-to-128 path).
    B3, H3, W3 = 3, 10, 13
    out3 = jax.random.normal(ks[6], (B3, H3, W3), jnp.float32)
    lab3 = jax.random.normal(ks[7], (B3, H3, W3), jnp.float32)
    msk3 = (jax.random.uniform(ks[8], (B3, H3, W3)) > 0.3).astype(jnp.float32)
    loss3 = jax.block_until_ready(masked_huber_loss(out3, lab3, msk3))
    ref3 = _reference(out3, lab3, msk3)
    assert jnp.allclose(loss3, ref3, rtol=1e-5, atol=1e-5), (loss3, ref3)

    print("KERNEL_OK")
</pallas_src>

<mosaic_0001>
module attributes {stable_mosaic.version = 11 : i64} {
  func.func @kernel(%arg0: i32, %arg1: i32, %arg2: memref<2x2x128xf32, #tpu.memory_space<vmem>>, %arg3: memref<2x2x128xf32, #tpu.memory_space<vmem>>, %arg4: memref<2x2x128xf32, #tpu.memory_space<vmem>>, %arg5: memref<1x2x128xf32, #tpu.memory_space<vmem>>, %arg6: memref<1x2x128xf32, #tpu.memory_space<vmem>>) attributes {dimension_semantics = [#tpu.dimension_semantics<parallel>, #tpu.dimension_semantics<arbitrary>], iteration_bounds = array<i64: 1, 1>, scalar_prefetch = 0 : i64, scratch_operands = 0 : i64, tpu.core_type = #tpu.core_type<tc>, window_params = [{transform_indices = @transform_0, window_bounds = array<i64: 2, 2, 128>}, {transform_indices = @transform_1, window_bounds = array<i64: 2, 2, 128>}, {transform_indices = @transform_2, window_bounds = array<i64: 2, 2, 128>}, {transform_indices = @transform_3, window_bounds = array<i64: 1, 2, 128>}, {transform_indices = @transform_4, window_bounds = array<i64: 1, 2, 128>}]} {
    %c0_i32 = arith.constant 0 : i32
    %0 = arith.cmpi eq, %arg1, %c0_i32 : i32
    %1 = arith.extui %0 : i1 to i32
    %c0_i32_0 = arith.constant 0 : i32
    %2 = arith.cmpi ne, %1, %c0_i32_0 : i32
    scf.if %2 {
      %cst_24 = arith.constant 0.000000e+00 : f32
      %29 = vector.broadcast %cst_24 : f32 to vector<2x128xf32>
      %c0_25 = arith.constant 0 : index
      %c0_26 = arith.constant 0 : index
      %c0_27 = arith.constant 0 : index
      %30 = vector.load %arg5[%c0_25, %c0_26, %c0_27] : memref<1x2x128xf32, #tpu.memory_space<vmem>>, vector<1x2x128xf32>
      %31 = vector.shape_cast %30 : vector<1x2x128xf32> to vector<2x128xf32>
      %32 = vector.shape_cast %29 : vector<2x128xf32> to vector<1x2x128xf32>
      tpu.vector_store %arg5[%c0_25, %c0_26, %c0_27], %32 {strides = array<i32>} : memref<1x2x128xf32, #tpu.memory_space<vmem>>, vector<1x2x128xf32>,
      %cst_28 = arith.constant 0.000000e+00 : f32
      %33 = vector.broadcast %cst_28 : f32 to vector<2x128xf32>
      %c0_29 = arith.constant 0 : index
      %c0_30 = arith.constant 0 : index
      %c0_31 = arith.constant 0 : index
      %34 = vector.load %arg6[%c0_29, %c0_30, %c0_31] : memref<1x2x128xf32, #tpu.memory_space<vmem>>, vector<1x2x128xf32>
      %35 = vector.shape_cast %34 : vector<1x2x128xf32> to vector<2x128xf32>
      %36 = vector.shape_cast %33 : vector<2x128xf32> to vector<1x2x128xf32>
      tpu.vector_store %arg6[%c0_29, %c0_30, %c0_31], %36 {strides = array<i32>} : memref<1x2x128xf32, #tpu.memory_space<vmem>>, vector<1x2x128xf32>,
    } else {
    }
    %c0 = arith.constant 0 : index
    %c0_1 = arith.constant 0 : index
    %c0_2 = arith.constant 0 : index
    %3 = vector.load %arg2[%c0, %c0_1, %c0_2] : memref<2x2x128xf32, #tpu.memory_space<vmem>>, vector<2x2x128xf32>
    %c0_3 = arith.constant 0 : index
    %c0_4 = arith.constant 0 : index
    %c0_5 = arith.constant 0 : index
    %4 = vector.load %arg3[%c0_3, %c0_4, %c0_5] : memref<2x2x128xf32, #tpu.memory_space<vmem>>, vector<2x2x128xf32>
    %c0_6 = arith.constant 0 : index
    %c0_7 = arith.constant 0 : index
    %c0_8 = arith.constant 0 : index
    %5 = vector.load %arg4[%c0_6, %c0_7, %c0_8] : memref<2x2x128xf32, #tpu.memory_space<vmem>>, vector<2x2x128xf32>
    %6 = arith.subf %3, %4 : vector<2x2x128xf32>
    %7 = arith.mulf %6, %5 : vector<2x2x128xf32>
    %8 = math.absf %7 : vector<2x2x128xf32>
    %cst = arith.constant 1.000000e+00 : f32
    %9 = vector.broadcast %cst : f32 to vector<2x2x128xf32>
    %10 = arith.minimumf %8, %9 : vector<2x2x128xf32>
    %cst_9 = arith.constant 5.000000e-01 : f32
    %11 = vector.broadcast %cst_9 : f32 to vector<2x2x128xf32>
    %12 = arith.mulf %11, %10 : vector<2x2x128xf32>
    %13 = arith.subf %8, %12 : vector<2x2x128xf32>
    %14 = arith.mulf %10, %13 : vector<2x2x128xf32>
    %c0_10 = arith.constant 0 : index
    %c0_11 = arith.constant 0 : index
    %c0_12 = arith.constant 0 : index
    %15 = vector.load %arg5[%c0_10, %c0_11, %c0_12] : memref<1x2x128xf32, #tpu.memory_space<vmem>>, vector<1x2x128xf32>
    %16 = vector.shape_cast %15 : vector<1x2x128xf32> to vector<2x128xf32>
    %cst_13 = arith.constant dense<0.000000e+00> : vector<2x128xf32>
    %17 = vector.multi_reduction <add>, %14, %cst_13 [1] : vector<2x2x128xf32> to vector<2x128xf32>
    %18 = arith.addf %16, %17 : vector<2x128xf32>
    %c0_14 = arith.constant 0 : index
    %c0_15 = arith.constant 0 : index
    %c0_16 = arith.constant 0 : index
    %19 = vector.load %arg5[%c0_14, %c0_15, %c0_16] : memref<1x2x128xf32, #tpu.memory_space<vmem>>, vector<1x2x128xf32>
    %20 = vector.shape_cast %19 : vector<1x2x128xf32> to vector<2x128xf32>
    %21 = vector.shape_cast %18 : vector<2x128xf32> to vector<1x2x128xf32>
    tpu.vector_store %arg5[%c0_14, %c0_15, %c0_16], %21 {strides = array<i32>} : memref<1x2x128xf32, #tpu.memory_space<vmem>>, vector<1x2x128xf32>,
    %c0_17 = arith.constant 0 : index
    %c0_18 = arith.constant 0 : index
    %c0_19 = arith.constant 0 : index
    %22 = vector.load %arg6[%c0_17, %c0_18, %c0_19] : memref<1x2x128xf32, #tpu.memory_space<vmem>>, vector<1x2x128xf32>
    %23 = vector.shape_cast %22 : vector<1x2x128xf32> to vector<2x128xf32>
    %cst_20 = arith.constant dense<0.000000e+00> : vector<2x128xf32>
    %24 = vector.multi_reduction <add>, %5, %cst_20 [1] : vector<2x2x128xf32> to vector<2x128xf32>
    %25 = arith.addf %23, %24 : vector<2x128xf32>
    %c0_21 = arith.constant 0 : index
    %c0_22 = arith.constant 0 : index
    %c0_23 = arith.constant 0 : index
    %26 = vector.load %arg6[%c0_21, %c0_22, %c0_23] : memref<1x2x128xf32, #tpu.memory_space<vmem>>, vector<1x2x128xf32>
    %27 = vector.shape_cast %26 : vector<1x2x128xf32> to vector<2x128xf32>
    %28 = vector.shape_cast %25 : vector<2x128xf32> to vector<1x2x128xf32>
    tpu.vector_store %arg6[%c0_21, %c0_22, %c0_23], %28 {strides = array<i32>} : memref<1x2x128xf32, #tpu.memory_space<vmem>>, vector<1x2x128xf32>,
    return
  }
  func.func @transform_0(%arg0: i32, %arg1: i32) -> (i32, i32, i32) {
    %c1_i32 = arith.constant 1 : i32
    %0 = arith.muli %arg0, %c1_i32 : i32
    %1 = arith.addi %0, %arg1 : i32
    %c0_i32 = arith.constant 0 : i32
    %2 = arith.minsi %1, %c0_i32 : i32
    %c0_i32_0 = arith.constant 0 : i32
    %c0_i32_1 = arith.constant 0 : i32
    %c0_i32_2 = arith.constant 0 : i32
    return %c0_i32_0, %2, %c0_i32_1 : i32, i32, i32
  }
  func.func @transform_1(%arg0: i32, %arg1: i32) -> (i32, i32, i32) {
    %c1_i32 = arith.constant 1 : i32
    %0 = arith.muli %arg0, %c1_i32 : i32
    %1 = arith.addi %0, %arg1 : i32
    %c0_i32 = arith.constant 0 : i32
    %2 = arith.minsi %1, %c0_i32 : i32
    %c0_i32_0 = arith.constant 0 : i32
    %c0_i32_1 = arith.constant 0 : i32
    %c0_i32_2 = arith.constant 0 : i32
    return %c0_i32_0, %2, %c0_i32_1 : i32, i32, i32
  }
  func.func @transform_2(%arg0: i32, %arg1: i32) -> (i32, i32, i32) {
    %c1_i32 = arith.constant 1 : i32
    %0 = arith.muli %arg0, %c1_i32 : i32
    %1 = arith.addi %0, %arg1 : i32
    %c0_i32 = arith.constant 0 : i32
    %2 = arith.minsi %1, %c0_i32 : i32
    %c0_i32_0 = arith.constant 0 : i32
    %c0_i32_1 = arith.constant 0 : i32
    %c0_i32_2 = arith.constant 0 : i32
    return %c0_i32_0, %2, %c0_i32_1 : i32, i32, i32
  }
  func.func @transform_3(%arg0: i32, %arg1: i32) -> (i32, i32, i32) {
    %c0_i32 = arith.constant 0 : i32
    %c0_i32_0 = arith.constant 0 : i32
    %c0_i32_1 = arith.constant 0 : i32
    return %arg0, %c0_i32, %c0_i32_0 : i32, i32, i32
  }
  func.func @transform_4(%arg0: i32, %arg1: i32) -> (i32, i32, i32) {
    %c0_i32 = arith.constant 0 : i32
    %c0_i32_0 = arith.constant 0 : i32
    %c0_i32_1 = arith.constant 0 : i32
    return %arg0, %c0_i32, %c0_i32_0 : i32, i32, i32
  }
}

</mosaic_0001>

<bundles_post_ra>
// kernel: tpu_custom_call.1
= control target key start
LH: loop header
LB: loop body
LE: loop exit
PB: predicated region body
PF: predicated region fallthrough
CT: control target
= control target key end

     0   :  { %10 = vsyncpa [#allocation3], 0  ;;  %s394_s0 = inlined_call_operand.hbm [shape: f32[2,2,128], index: 0, kind: input, shape index: {}]   ;;  %s395_s1 = inlined_call_operand.hbm [shape: f32[2,2,128], index: 1, kind: input, shape index: {}]   ;;  %s396_s2 = inlined_call_operand.vmem [shape: f32[2,2,128], index: 2, kind: input, shape index: {}]   ;;  %s397_s3 = inlined_call_operand.hbm [shape: f32[1,2,128], index: 3, kind: output, shape index: {0}]   ;;  %s398_s4 = inlined_call_operand.hbm [shape: f32[1,2,128], index: 4, kind: output, shape index: {1}]  }
   0x1   :  { %11 = vsyncpa [#allocation6], 0 }
   0x2   :  { %12 = vsyncpa [#allocation4], 0 }
   0x3   :  { %13 = vsyncpa [#allocation9], 0  ;;  %s302_s15 = smov [#allocation2]   ;;  %s206_s19 = scalar_lea.hbm %s394_s0, 64 }
   0x4   :  { %s24_s16 = sshll.u32 %s302_s15, 4  ;;  %p207_p0 = scmp.ne.s32.totalorder %s394_s0, %s206_s19  ;;  %s25_s16 = int_to_ptr.vmem [resolvable:$true] %s24_s16 }
   0x5   :  { %p210_p1 = scmp.lt.u32.totalorder %s206_s19, %s394_s0 }
   0x7   :  { %p212_p2 = pnand %p210_p1, %p207_p0 }
   0x9   :  { %215 = shalt.err (!%p212_p2)
}
   0xa   :  { %s216_s24 = scalar_lea.vmem %s25_s16, 64  ;;  %p221_p4 = scmp.lt.s32.totalorder %s25_s16, %s25_s16 }
   0xb   :  { %p217_p3 = scmp.ne.s32.totalorder %s25_s16, %s216_s24  ;;  %p222_p5 = scmp.lt.s32.totalorder %s216_s24, %s216_s24 }
   0xd   :  { %p223_p6 = por %p222_p5, %p221_p4 }
   0xf   :  { %p224_p7 = pnand %p223_p6, %p217_p3 }
  0x11   :  { %227 = shalt.err (!%p224_p7)
}
  0x12   :  { %s303_s25 = smov 32   ;;  %s304_s26 = smov 2  }
  0x13   :  { %30 = dma.hbm_to_vmem [thread:$0]  %s394_s0, 64, %s25_s16, [#allocation3], %s303_s25, %s303_s25, %s304_s26  }
  0x14   :  { %s305_s29 = smov [#allocation5]   ;;  %s228_s7 = scalar_lea.hbm %s395_s1, 64 }
  0x15   :  { %s41_s30 = sshll.u32 %s305_s29, 4  ;;  %p229_p8 = scmp.ne.s32.totalorder %s395_s1, %s228_s7  ;;  %s42_s30 = int_to_ptr.vmem [resolvable:$true] %s41_s30 }
  0x16   :  { %p232_p9 = scmp.lt.u32.totalorder %s228_s7, %s395_s1 }
  0x18   :  { %p234_p10 = pnand %p232_p9, %p229_p8 }
  0x1a   :  { %237 = shalt.err (!%p234_p10)
}
  0x1b   :  { %s238_s12 = scalar_lea.vmem %s42_s30, 64  ;;  %p243_p12 = scmp.lt.s32.totalorder %s42_s30, %s42_s30 }
  0x1c   :  { %p239_p11 = scmp.ne.s32.totalorder %s42_s30, %s238_s12  ;;  %p244_p13 = scmp.lt.s32.totalorder %s238_s12, %s238_s12 }
  0x1e   :  { %p245_p0 = por %p244_p13, %p243_p12 }
  0x20   :  { %p246_p1 = pnand %p245_p0, %p239_p11 }
  0x22   :  { %249 = shalt.err (!%p246_p1)
}
  0x23   :  { %47 = dma.hbm_to_vmem [thread:$0]  %s395_s1, 64, %s42_s30, [#allocation6], %s303_s25, %s303_s25, %s304_s26  }
  0x24   :  { %294 = dma.done.wait [#allocation3], 64  }
  0x25   :  { %295 = vsyncadd [#allocation3], 4294967232 }
  0x26   :  { %296 = dma.done.wait [#allocation6], 64  }
  0x27   :  { %297 = vsyncadd [#allocation6], 4294967232  ;;  %v306_v0 = vmov 0.0   ;;  %vm116_vm0 = vcmask 1041408   ;;  %v95_v1 = vld [vmem:[#allocation2] sm:$0x3] }
  0x28   :  { %93 = vst [vmem:[#allocation7] sm:$0x3] %v306_v0  ;;  %94 = vst [vmem:[#allocation8] sm:$0x3] %v306_v0  ;;  %v96_v2 = vld [vmem:[#allocation2 + $0x2] sm:$0x3] }
  0x29   :  { %v97_v3 = vld [vmem:[#allocation5] sm:$0x3]  ;;  %v98_v4 = vld [vmem:[#allocation5 + $0x2] sm:$0x3]  ;;  %v99_v5 = vld [vmem:[%s396_s2] sm:$0x3] }
  0x2a   :  { %v100_v6 = vld [vmem:[%s396_s2 + $0x2] sm:$0x3]  ;;  %v101_v7 = vsub.f32 %v95_v1, %v97_v3  ;;  %v102_v8 = vsub.f32 %v96_v2, %v98_v4  ;;  %v139_v9 = vsel %vm116_vm0, %v99_v5, 0.0  ;;  %vm133_vm1 = vcmask 1041409   ;;  %s307_s1 = smov [#allocation8]  }
  0x2b   :  { %v146_v10 = vsel %vm116_vm0, %v100_v6, 0.0  ;;  %v140_v12 = vrot.slane %v139_v9, 4  ;;  %s175_s2 = sshll.u32 %s307_s1, 4  ;;  %s176_s2 = int_to_ptr.vmem [resolvable:$true] %s175_s2 }
  0x2c   :  { %v103_v11 = vmul.f32 %v101_v7, %v99_v5  ;;  %v147_v13 = vrot.slane %v146_v10, 4  ;;  %v104_v14 = vmul.f32 %v102_v8, %v100_v6  ;;  %s250_s18 = scalar_lea.vmem %s176_s2, 32  ;;  %p255_p3 = scmp.lt.s32.totalorder %s176_s2, %s176_s2 }
  0x2d   :  { %v141_v16 = vadd.f32 %v140_v12, %v139_v9  ;;  %p251_p2 = scmp.ne.s32.totalorder %s176_s2, %s250_s18  ;;  %p256_p4 = scmp.lt.s32.totalorder %s250_s18, %s250_s18 }
  0x2e   :  { %v105_v15 = vand.u32 2147483647, %v103_v11  ;;  %v148_v17 = vadd.f32 %v147_v13, %v146_v10  ;;  %v106_v18 = vand.u32 2147483647, %v104_v14 }
  0x2f   :  { %v142_v20 = vrot.slane %v141_v16, 2  ;;  %v138_v32 = vld [vmem:[#allocation8] sm:$0x3]  ;;  %p257_p5 = por %p256_p4, %p255_p3 }
  0x30   :  { %v107_v19 = vmin.f32 %v105_v15, 1.0  ;;  %v149_v21 = vrot.slane %v148_v17, 2  ;;  %v108_v22 = vmin.f32 %v106_v18, 1.0 }
  0x31   :  { %v143_v24 = vadd.f32 %v142_v20, %v141_v16  ;;  %p258_p6 = pnand %p257_p5, %p251_p2 }
  0x32   :  { %v109_v23 = vmul.f32 0.5, %v107_v19  ;;  %v150_v25 = vadd.f32 %v149_v21, %v148_v17  ;;  %v110_v26 = vmul.f32 0.5, %v108_v22 }
  0x33   :  { %v144_v28 = vrot.slane %v143_v24, 1 }
  0x34   :  { %v111_v27 = vsub.f32 %v105_v15, %v109_v23  ;;  %v151_v29 = vrot.slane %v150_v25, 1  ;;  %v112_v30 = vsub.f32 %v106_v18, %v110_v26 }
  0x35   :  { %v145_v33 = vadd.f32 %v144_v28, %v143_v24 }
  0x36   :  { %v113_v31 = vmul.f32 %v111_v27, %v107_v19  ;;  %v152_v34 = vadd.f32 %v151_v29, %v150_v25  ;;  %v114_v35 = vmul.f32 %v112_v30, %v108_v22 }
  0x38   :  { %v117_v36 = vsel %vm116_vm0, %v113_v31, 0.0  ;;  %v155_v37 = vsel %vm133_vm1, %v152_v34, %v145_v33  ;;  %v124_v39 = vsel %vm116_vm0, %v114_v35, 0.0 }
  0x39   :  { %v118_v38 = vrot.slane %v117_v36, 4  ;;  %v157_v40 = vadd.f32 %v155_v37, %v138_v32  ;;  %v125_v41 = vrot.slane %v124_v39, 4 }
  0x3b   :  { %v119_v42 = vadd.f32 %v118_v38, %v117_v36  ;;  %158 = vst [vmem:[#allocation8] sm:$0x3] %v157_v40  ;;  %v126_v43 = vadd.f32 %v125_v41, %v124_v39 }
  0x3c   :  { %261 = shalt.err (!%p258_p6)
}
  0x3d   :  { %s262_s21 = scalar_lea.hbm %s398_s4, 32 }
  0x3e   :  { %p263_p7 = scmp.ne.s32.totalorder %s398_s4, %s262_s21  ;;  %p266_p8 = scmp.lt.u32.totalorder %s262_s21, %s398_s4 }
  0x40   :  { %p268_p9 = pnand %p266_p8, %p263_p7 }
  0x42   :  { %271 = shalt.err (!%p268_p9)
}
  0x43   :  { %178 = dma.vmem_to_hbm [thread:$0]  %s176_s2, 32, %s398_s4, [#allocation9]   ;;  %v120_v44 = vrot.slane %v119_v42, 2  ;;  %v127_v45 = vrot.slane %v126_v43, 2  ;;  %v115_v51 = vld [vmem:[#allocation7] sm:$0x3] }
  0x44   :  { %s308_s28 = smov [#allocation7]  }
  0x45   :  { %v121_v46 = vadd.f32 %v120_v44, %v119_v42  ;;  %v128_v47 = vadd.f32 %v127_v45, %v126_v43  ;;  %s165_s29 = sshll.u32 %s308_s28, 4  ;;  %s166_s29 = int_to_ptr.vmem [resolvable:$true] %s165_s29 }
  0x46   :  { %s272_s30 = scalar_lea.vmem %s166_s29, 32  ;;  %p277_p11 = scmp.lt.s32.totalorder %s166_s29, %s166_s29 }
  0x47   :  { %v122_v48 = vrot.slane %v121_v46, 1  ;;  %v129_v49 = vrot.slane %v128_v47, 1  ;;  %p273_p10 = scmp.ne.s32.totalorder %s166_s29, %s272_s30  ;;  %p278_p12 = scmp.lt.s32.totalorder %s272_s30, %s272_s30 }
  0x49   :  { %v123_v50 = vadd.f32 %v122_v48, %v121_v46  ;;  %v130_v52 = vadd.f32 %v129_v49, %v128_v47  ;;  %p279_p13 = por %p278_p12, %p277_p11 }
  0x4b   :  { %v134_v53 = vsel %vm133_vm1, %v130_v52, %v123_v50  ;;  %p280_p0 = pnand %p279_p13, %p273_p10 }
  0x4c   :  { %v136_v54 = vadd.f32 %v134_v53, %v115_v51 }
  0x4e   :  { %137 = vst [vmem:[#allocation7] sm:$0x3] %v136_v54 }
  0x4f   :  { %283 = shalt.err (!%p280_p0)
}
  0x50   :  { %s284_s6 = scalar_lea.hbm %s397_s3, 32 }
  0x51   :  { %p285_p1 = scmp.ne.s32.totalorder %s397_s3, %s284_s6  ;;  %p288_p2 = scmp.lt.u32.totalorder %s284_s6, %s397_s3 }
  0x53   :  { %p290_p3 = pnand %p288_p2, %p285_p1 }
  0x55   :  { %293 = shalt.err (!%p290_p3)
}
  0x56   :  { %168 = dma.vmem_to_hbm [thread:$0]  %s166_s29, 32, %s397_s3, [#allocation4]  }
  0x57   :  { %298 = dma.done.wait [#allocation4], 32  }
  0x58   :  { %299 = vsyncadd [#allocation4], 4294967264 }
  0x59   :  { %300 = dma.done.wait [#allocation9], 32  }
  0x5a   :  { %301 = vsyncadd [#allocation9], 4294967264 }
  0x5b   :  { %185 = vsyncpa [#allocation3], 1 }
  0x5c   :  { %186 = vsyncpa [#allocation6], 1 }
  0x5d   :  { %187 = vsyncpa [#allocation4], 1 }
  0x5e   :  { %188 = vsyncpa [#allocation9], 1 }

</bundles_post_ra>
